<compile_context>
chip_gen: v7x
topology: tpu7x:2x2x1
jax: 0.10.0
libtpu: 0.0.40
codegen_flags: <defaults>
</compile_context>

<pallas_src>
import functools

import jax
import jax.numpy as jnp
from jax.experimental import pallas as pl
from jax.experimental.pallas import tpu as pltpu


def _st_gen_deconv_kernel(x_ref, wg_ref, abd_ref, d1_ref, s_ref, wt_ref, b2_ref,
                          o_ref, *, K, C_out, KT, PT, apply_relu):
    """One batch element.  Every slab is (channels, time*joints): lane-dense."""
    x = x_ref[0].astype(jnp.float32)                         # (C_in, T*V)

    # --- GCN 1x1 conv (BN1 scale pre-folded into the weights) ----------------
    y = jnp.dot(wg_ref[...], x, preferred_element_type=jnp.float32)  # (K*C_out, T*V)

    # --- graph contraction with block-diagonal adjacency ---------------------
    # z = sum_k y_k @ kron(I_T, A_k): keeps the (C, T*V) layout, no relayouts.
    # d1 carries (gcn bias propagated through A) * bn1_scale + bn1_shift.
    z = d1_ref[...]
    for k in range(K):                                       # K small & static
        z = z + jnp.dot(y[k * C_out:(k + 1) * C_out, :], abd_ref[k],
                        preferred_element_type=jnp.float32)
    z = jnp.maximum(z, 0.0)                                  # BN1 (folded) + ReLU

    # --- fused nearest-upsample (T -> 2T) + zero-pad + temporal shift --------
    # Each tap's window is one (T*V, 2T*V) selection matmul.  The dt == PT tap
    # is the pure frame-duplication matrix, so the identity residual
    # (upsampled x) is produced by the same matmul.  BN2 scale is pre-folded
    # into wt; b2 holds tcn bias * bn2_scale + bn2_shift.
    res = None
    acc = None
    for dt in range(KT):                                     # KT small & static
        if dt == PT:
            both = jnp.dot(jnp.concatenate([z, x], axis=0), s_ref[dt],
                           preferred_element_type=jnp.float32)     # (2C, 2T*V)
            win = both[:C_out, :]
            res = both[C_out:, :]
        else:
            win = jnp.dot(z, s_ref[dt], preferred_element_type=jnp.float32)
        part = jnp.dot(wt_ref[dt], win, preferred_element_type=jnp.float32)
        acc = part if acc is None else acc + part

    out = acc + res + b2_ref[...]
    if apply_relu:
        out = jnp.maximum(out, 0.0)
    o_ref[...] = out[None, :, :].astype(o_ref.dtype)


@functools.partial(jax.jit, static_argnames=("apply_relu",))
def st_gen_deconv_forward(x, A, params, *, apply_relu):
    """x: (N, C_in, T, V) float32; A: (K, V, V). Returns (out (N,C_out,2T,V), A)."""
    N, C_in, T, V = x.shape
    K = A.shape[0]
    C_out = params["w_gcn"].shape[0] // K
    KT = params["w_tcn"].shape[0]
    PT = (KT - 1) // 2
    T2 = 2 * T
    TV, T2V = T * V, T2 * V

    assert C_in == C_out, "identity residual path requires in_channels == out_channels"
    assert KT % 2 == 1

    f32 = jnp.float32
    s1, t1 = params["bn1_scale"], params["bn1_shift"]          # (C_out, 1)
    s2, t2 = params["bn2_scale"], params["bn2_shift"]          # (C_out, 1)

    # --- fold BN affines + conv biases into weights / small additive slabs ---
    wg = params["w_gcn"].astype(f32) * jnp.tile(s1, (K, 1))    # (K*C_out, C_in)
    colsum_a = jnp.sum(A.astype(f32), axis=1)                  # (K, V)
    bias_gcn = jnp.einsum("kc,kw->cw",
                          params["b_gcn"].reshape(K, C_out).astype(f32), colsum_a)
    d1 = jnp.tile(s1 * bias_gcn + t1, (1, T))                  # (C_out, T*V)

    wt = params["w_tcn"].astype(f32) * s2[None, :, :]          # (KT, C_out, C_out)
    b2 = s2 * params["b_tcn"] + t2                             # (C_out, 1)

    # --- block-diagonal adjacency: A_bd[k] = kron(I_T, A[k]) -----------------
    a_bd = jnp.einsum("ts,kvw->ktvsw", jnp.eye(T, dtype=f32),
                      A.astype(f32)).reshape(K, TV, TV)

    # --- fused upsample + zero-pad + shift selection matrices (one per tap) --
    eye_v = jnp.eye(V, dtype=f32)
    t_rows = jnp.arange(T)[:, None]
    s_taps = []
    for dt in range(KT):
        src = jnp.arange(T2) + dt - PT                 # source (upsampled) frame
        valid = (src >= 0) & (src < T2)                # zero-padding of the conv
        sel = (t_rows == (jnp.clip(src, 0, T2 - 1) // 2)[None, :]) & valid[None, :]
        s_taps.append(jnp.einsum("ts,vw->tvsw", sel.astype(f32),
                                 eye_v).reshape(TV, T2V))
    s_all = jnp.stack(s_taps, axis=0)                  # (KT, T*V, 2T*V)

    # --- lane-dense slabs: (T, V) folded to T*V so V never sits alone on lanes
    x_flat = x.reshape(N, C_in, TV)

    kern = functools.partial(_st_gen_deconv_kernel, K=K, C_out=C_out,
                             KT=KT, PT=PT, apply_relu=apply_relu)

    def const_spec(shape):
        nd = len(shape)
        return pl.BlockSpec(shape, lambda n, _nd=nd: (0,) * _nd)

    out_flat = pl.pallas_call(
        kern,
        out_shape=jax.ShapeDtypeStruct((N, C_out, T2V), x.dtype),
        grid=(N,),
        in_specs=[
            pl.BlockSpec((1, C_in, TV), lambda n: (n, 0, 0)),   # per-batch x slab
            const_spec(wg.shape),
            const_spec(a_bd.shape),
            const_spec(d1.shape),
            const_spec(s_all.shape),
            const_spec(wt.shape),
            const_spec(b2.shape),
        ],
        out_specs=pl.BlockSpec((1, C_out, T2V), lambda n: (n, 0, 0)),
        compiler_params=pltpu.CompilerParams(dimension_semantics=("parallel",)),
    )(x_flat, wg, a_bd, d1, s_all, wt, b2)

    return out_flat.reshape(N, C_out, T2, V), A


def reference_forward(x, A, p, *, apply_relu):
    """Pure-JAX reference of the same forward pass (for correctness checking)."""
    xu = jnp.repeat(x, 2, axis=2)
    N, C_in, T2, V = xu.shape
    K = A.shape[0]
    C_out = p["w_gcn"].shape[0] // K
    y = jnp.einsum("oc,nctv->notv", p["w_gcn"], xu) + p["b_gcn"].reshape(1, -1, 1, 1)
    y = y.reshape(N, K, C_out, T2, V)
    z = jnp.einsum("nkctv,kvw->nctw", y, A)
    z = z * p["bn1_scale"].reshape(1, -1, 1, 1) + p["bn1_shift"].reshape(1, -1, 1, 1)
    z = jnp.maximum(z, 0.0)
    KT = p["w_tcn"].shape[0]
    PT = (KT - 1) // 2
    zp = jnp.pad(z, ((0, 0), (0, 0), (PT, PT), (0, 0)))
    acc = jnp.zeros_like(z)
    for dt in range(KT):
        acc = acc + jnp.einsum("oc,nctv->notv", p["w_tcn"][dt], zp[:, :, dt:dt + T2, :])
    acc = acc + p["b_tcn"].reshape(1, -1, 1, 1)
    acc = acc * p["bn2_scale"].reshape(1, -1, 1, 1) + p["bn2_shift"].reshape(1, -1, 1, 1)
    out = acc + xu
    if apply_relu:
        out = jnp.maximum(out, 0.0)
    return out


def make_params(key, C_in, C_out, K, KT, eps=1e-5):
    """Deterministic synthetic parameters (module shapes from __init__)."""
    ks = jax.random.split(key, 14)
    s = 0.1
    w_gcn = jax.random.normal(ks[0], (K * C_out, C_in), jnp.float32) * s
    b_gcn = jax.random.normal(ks[1], (K * C_out, 1), jnp.float32) * s
    w_tcn = jax.random.normal(ks[2], (KT, C_out, C_out), jnp.float32) * s
    b_tcn = jax.random.normal(ks[3], (C_out, 1), jnp.float32) * s

    def bn(k0, k1, k2, k3):
        gamma = 1.0 + 0.1 * jax.random.normal(k0, (C_out, 1), jnp.float32)
        beta = 0.1 * jax.random.normal(k1, (C_out, 1), jnp.float32)
        mean = 0.1 * jax.random.normal(k2, (C_out, 1), jnp.float32)
        var = 0.5 + jnp.abs(jax.random.normal(k3, (C_out, 1), jnp.float32))
        scale = gamma / jnp.sqrt(var + eps)
        shift = beta - mean * scale
        return scale, shift

    bn1_scale, bn1_shift = bn(ks[4], ks[5], ks[6], ks[7])
    bn2_scale, bn2_shift = bn(ks[8], ks[9], ks[10], ks[11])
    return {
        "w_gcn": w_gcn, "b_gcn": b_gcn,
        "w_tcn": w_tcn, "b_tcn": b_tcn,
        "bn1_scale": bn1_scale, "bn1_shift": bn1_shift,
        "bn2_scale": bn2_scale, "bn2_shift": bn2_shift,
    }


if __name__ == "__main__":
    # Small config: st_gen_deconv(in=16, out=16, kernel_size=(3, 3), stride=1)
    N, C_in, C_out, T, V = 2, 16, 16, 8, 16
    K, KT = 3, 3  # kernel_size = (temporal KT, spatial K)

    key = jax.random.PRNGKey(0)
    kx, kA, kp = jax.random.split(key, 3)
    x = jax.random.normal(kx, (N, C_in, T, V), jnp.float32)
    A = jax.random.normal(kA, (K, V, V), jnp.float32) * 0.2
    params = make_params(kp, C_in, C_out, K, KT)

    apply_relu = (C_in != 3)  # mirrors the `if b == 3` early-return branch

    out, A_out = st_gen_deconv_forward(x, A, params, apply_relu=apply_relu)
    out = jax.block_until_ready(out)

    ref = reference_forward(x, A, params, apply_relu=apply_relu)
    assert out.shape == (N, C_out, 2 * T, V), out.shape
    assert jnp.allclose(out, ref, atol=1e-4, rtol=1e-4), "mismatch vs reference"
    assert jnp.allclose(A_out, A), "A must be returned unchanged"

    print("KERNEL_OK")
</pallas_src>

<mosaic_0001>
module attributes {stable_mosaic.version = 11 : i64} {
  func.func @_st_gen_deconv_kernel(%arg0: i32, %arg1: memref<1x16x128xf32, #tpu.memory_space<vmem>>, %arg2: memref<48x16xf32, #tpu.memory_space<vmem>>, %arg3: memref<3x128x128xf32, #tpu.memory_space<vmem>>, %arg4: memref<16x128xf32, #tpu.memory_space<vmem>>, %arg5: memref<3x128x256xf32, #tpu.memory_space<vmem>>, %arg6: memref<3x16x16xf32, #tpu.memory_space<vmem>>, %arg7: memref<16x1xf32, #tpu.memory_space<vmem>>, %arg8: memref<1x16x256xf32, #tpu.memory_space<vmem>>) attributes {dimension_semantics = [#tpu.dimension_semantics<parallel>], iteration_bounds = array<i64: 2>, scalar_prefetch = 0 : i64, scratch_operands = 0 : i64, tpu.core_type = #tpu.core_type<tc>, window_params = [{transform_indices = @transform_0, window_bounds = array<i64: 1, 16, 128>}, {pipeline_mode = #tpu.pipeline_mode<synchronous>, transform_indices = @transform_1, window_bounds = array<i64: 48, 16>}, {pipeline_mode = #tpu.pipeline_mode<synchronous>, transform_indices = @transform_2, window_bounds = array<i64: 3, 128, 128>}, {pipeline_mode = #tpu.pipeline_mode<synchronous>, transform_indices = @transform_3, window_bounds = array<i64: 16, 128>}, {pipeline_mode = #tpu.pipeline_mode<synchronous>, transform_indices = @transform_4, window_bounds = array<i64: 3, 128, 256>}, {pipeline_mode = #tpu.pipeline_mode<synchronous>, transform_indices = @transform_5, window_bounds = array<i64: 3, 16, 16>}, {pipeline_mode = #tpu.pipeline_mode<synchronous>, transform_indices = @transform_6, window_bounds = array<i64: 16, 1>}, {transform_indices = @transform_7, window_bounds = array<i64: 1, 16, 256>}]} {
    %c0 = arith.constant 0 : index
    %c0_0 = arith.constant 0 : index
    %c0_1 = arith.constant 0 : index
    %0 = vector.load %arg1[%c0, %c0_0, %c0_1] : memref<1x16x128xf32, #tpu.memory_space<vmem>>, vector<1x16x128xf32>
    %1 = vector.shape_cast %0 : vector<1x16x128xf32> to vector<16x128xf32>
    %c0_2 = arith.constant 0 : index
    %c0_3 = arith.constant 0 : index
    %2 = vector.load %arg2[%c0_2, %c0_3] : memref<48x16xf32, #tpu.memory_space<vmem>>, vector<48x16xf32>
    %cst = arith.constant dense<0.000000e+00> : vector<48x128xf32>
    %3 = tpu.matmul %2, %1, %cst {dimension_numbers = #tpu.dot_dimension_numbers<[1], [0], [0], [1], [0, 0, 1, 1], [], []>} : vector<48x16xf32>, vector<16x128xf32>, vector<48x128xf32> -> vector<48x128xf32>
    %c0_4 = arith.constant 0 : index
    %c0_5 = arith.constant 0 : index
    %4 = vector.load %arg4[%c0_4, %c0_5] : memref<16x128xf32, #tpu.memory_space<vmem>>, vector<16x128xf32>
    %5 = vector.extract_strided_slice %3 {offsets = [0, 0], sizes = [16, 128], strides = [1, 1]} : vector<48x128xf32> to vector<16x128xf32>
    %c0_6 = arith.constant 0 : index
    %c0_7 = arith.constant 0 : index
    %c0_8 = arith.constant 0 : index
    %6 = vector.load %arg3[%c0_6, %c0_7, %c0_8] : memref<3x128x128xf32, #tpu.memory_space<vmem>>, vector<1x128x128xf32>
    %7 = vector.shape_cast %6 : vector<1x128x128xf32> to vector<128x128xf32>
    %cst_9 = arith.constant dense<0.000000e+00> : vector<16x128xf32>
    %8 = tpu.matmul %5, %7, %cst_9 {dimension_numbers = #tpu.dot_dimension_numbers<[1], [0], [0], [1], [0, 0, 1, 1], [], []>} : vector<16x128xf32>, vector<128x128xf32>, vector<16x128xf32> -> vector<16x128xf32>
    %9 = arith.addf %4, %8 : vector<16x128xf32>
    %10 = vector.extract_strided_slice %3 {offsets = [16, 0], sizes = [16, 128], strides = [1, 1]} : vector<48x128xf32> to vector<16x128xf32>
    %c1 = arith.constant 1 : index
    %c0_10 = arith.constant 0 : index
    %c0_11 = arith.constant 0 : index
    %11 = vector.load %arg3[%c1, %c0_10, %c0_11] : memref<3x128x128xf32, #tpu.memory_space<vmem>>, vector<1x128x128xf32>
    %12 = vector.shape_cast %11 : vector<1x128x128xf32> to vector<128x128xf32>
    %cst_12 = arith.constant dense<0.000000e+00> : vector<16x128xf32>
    %13 = tpu.matmul %10, %12, %cst_12 {dimension_numbers = #tpu.dot_dimension_numbers<[1], [0], [0], [1], [0, 0, 1, 1], [], []>} : vector<16x128xf32>, vector<128x128xf32>, vector<16x128xf32> -> vector<16x128xf32>
    %14 = arith.addf %9, %13 : vector<16x128xf32>
    %15 = vector.extract_strided_slice %3 {offsets = [32, 0], sizes = [16, 128], strides = [1, 1]} : vector<48x128xf32> to vector<16x128xf32>
    %c2 = arith.constant 2 : index
    %c0_13 = arith.constant 0 : index
    %c0_14 = arith.constant 0 : index
    %16 = vector.load %arg3[%c2, %c0_13, %c0_14] : memref<3x128x128xf32, #tpu.memory_space<vmem>>, vector<1x128x128xf32>
    %17 = vector.shape_cast %16 : vector<1x128x128xf32> to vector<128x128xf32>
    %cst_15 = arith.constant dense<0.000000e+00> : vector<16x128xf32>
    %18 = tpu.matmul %15, %17, %cst_15 {dimension_numbers = #tpu.dot_dimension_numbers<[1], [0], [0], [1], [0, 0, 1, 1], [], []>} : vector<16x128xf32>, vector<128x128xf32>, vector<16x128xf32> -> vector<16x128xf32>
    %19 = arith.addf %14, %18 : vector<16x128xf32>
    %cst_16 = arith.constant 0.000000e+00 : f32
    %20 = vector.broadcast %cst_16 : f32 to vector<16x128xf32>
    %21 = arith.maximumf %19, %20 : vector<16x128xf32>
    %c0_17 = arith.constant 0 : index
    %c0_18 = arith.constant 0 : index
    %c0_19 = arith.constant 0 : index
    %22 = vector.load %arg5[%c0_17, %c0_18, %c0_19] : memref<3x128x256xf32, #tpu.memory_space<vmem>>, vector<1x128x256xf32>
    %23 = vector.shape_cast %22 : vector<1x128x256xf32> to vector<128x256xf32>
    %cst_20 = arith.constant dense<0.000000e+00> : vector<16x256xf32>
    %24 = tpu.matmul %21, %23, %cst_20 {dimension_numbers = #tpu.dot_dimension_numbers<[1], [0], [0], [1], [0, 0, 1, 1], [], []>} : vector<16x128xf32>, vector<128x256xf32>, vector<16x256xf32> -> vector<16x256xf32>
    %c0_21 = arith.constant 0 : index
    %c0_22 = arith.constant 0 : index
    %c0_23 = arith.constant 0 : index
    %25 = vector.load %arg6[%c0_21, %c0_22, %c0_23] : memref<3x16x16xf32, #tpu.memory_space<vmem>>, vector<1x16x16xf32>
    %26 = vector.shape_cast %25 : vector<1x16x16xf32> to vector<16x16xf32>
    %cst_24 = arith.constant dense<0.000000e+00> : vector<16x256xf32>
    %27 = tpu.matmul %26, %24, %cst_24 {dimension_numbers = #tpu.dot_dimension_numbers<[1], [0], [0], [1], [0, 0, 1, 1], [], []>} : vector<16x16xf32>, vector<16x256xf32>, vector<16x256xf32> -> vector<16x256xf32>
    %28 = tpu.concatenate %21, %1 in 0 : vector<16x128xf32>, vector<16x128xf32> -> vector<32x128xf32>
    %c1_25 = arith.constant 1 : index
    %c0_26 = arith.constant 0 : index
    %c0_27 = arith.constant 0 : index
    %29 = vector.load %arg5[%c1_25, %c0_26, %c0_27] : memref<3x128x256xf32, #tpu.memory_space<vmem>>, vector<1x128x256xf32>
    %30 = vector.shape_cast %29 : vector<1x128x256xf32> to vector<128x256xf32>
    %cst_28 = arith.constant dense<0.000000e+00> : vector<32x256xf32>
    %31 = tpu.matmul %28, %30, %cst_28 {dimension_numbers = #tpu.dot_dimension_numbers<[1], [0], [0], [1], [0, 0, 1, 1], [], []>} : vector<32x128xf32>, vector<128x256xf32>, vector<32x256xf32> -> vector<32x256xf32>
    %32 = vector.extract_strided_slice %31 {offsets = [0, 0], sizes = [16, 256], strides = [1, 1]} : vector<32x256xf32> to vector<16x256xf32>
    %33 = vector.extract_strided_slice %31 {offsets = [16, 0], sizes = [16, 256], strides = [1, 1]} : vector<32x256xf32> to vector<16x256xf32>
    %c1_29 = arith.constant 1 : index
    %c0_30 = arith.constant 0 : index
    %c0_31 = arith.constant 0 : index
    %34 = vector.load %arg6[%c1_29, %c0_30, %c0_31] : memref<3x16x16xf32, #tpu.memory_space<vmem>>, vector<1x16x16xf32>
    %35 = vector.shape_cast %34 : vector<1x16x16xf32> to vector<16x16xf32>
    %cst_32 = arith.constant dense<0.000000e+00> : vector<16x256xf32>
    %36 = tpu.matmul %35, %32, %cst_32 {dimension_numbers = #tpu.dot_dimension_numbers<[1], [0], [0], [1], [0, 0, 1, 1], [], []>} : vector<16x16xf32>, vector<16x256xf32>, vector<16x256xf32> -> vector<16x256xf32>
    %37 = arith.addf %27, %36 : vector<16x256xf32>
    %c2_33 = arith.constant 2 : index
    %c0_34 = arith.constant 0 : index
    %c0_35 = arith.constant 0 : index
    %38 = vector.load %arg5[%c2_33, %c0_34, %c0_35] : memref<3x128x256xf32, #tpu.memory_space<vmem>>, vector<1x128x256xf32>
    %39 = vector.shape_cast %38 : vector<1x128x256xf32> to vector<128x256xf32>
    %cst_36 = arith.constant dense<0.000000e+00> : vector<16x256xf32>
    %40 = tpu.matmul %21, %39, %cst_36 {dimension_numbers = #tpu.dot_dimension_numbers<[1], [0], [0], [1], [0, 0, 1, 1], [], []>} : vector<16x128xf32>, vector<128x256xf32>, vector<16x256xf32> -> vector<16x256xf32>
    %c2_37 = arith.constant 2 : index
    %c0_38 = arith.constant 0 : index
    %c0_39 = arith.constant 0 : index
    %41 = vector.load %arg6[%c2_37, %c0_38, %c0_39] : memref<3x16x16xf32, #tpu.memory_space<vmem>>, vector<1x16x16xf32>
    %42 = vector.shape_cast %41 : vector<1x16x16xf32> to vector<16x16xf32>
    %cst_40 = arith.constant dense<0.000000e+00> : vector<16x256xf32>
    %43 = tpu.matmul %42, %40, %cst_40 {dimension_numbers = #tpu.dot_dimension_numbers<[1], [0], [0], [1], [0, 0, 1, 1], [], []>} : vector<16x16xf32>, vector<16x256xf32>, vector<16x256xf32> -> vector<16x256xf32>
    %44 = arith.addf %37, %43 : vector<16x256xf32>
    %45 = arith.addf %44, %33 : vector<16x256xf32>
    %c0_41 = arith.constant 0 : index
    %c0_42 = arith.constant 0 : index
    %46 = vector.load %arg7[%c0_41, %c0_42] : memref<16x1xf32, #tpu.memory_space<vmem>>, vector<16x1xf32>
    %47 = vector.broadcast %46 : vector<16x1xf32> to vector<16x256xf32>
    %48 = arith.addf %45, %47 : vector<16x256xf32>
    %cst_43 = arith.constant 0.000000e+00 : f32
    %49 = vector.broadcast %cst_43 : f32 to vector<16x256xf32>
    %50 = arith.maximumf %48, %49 : vector<16x256xf32>
    %51 = vector.shape_cast %50 : vector<16x256xf32> to vector<1x16x256xf32>
    %c0_44 = arith.constant 0 : index
    %c0_45 = arith.constant 0 : index
    %c0_46 = arith.constant 0 : index
    %52 = vector.load %arg8[%c0_44, %c0_45, %c0_46] : memref<1x16x256xf32, #tpu.memory_space<vmem>>, vector<1x16x256xf32>
    tpu.vector_store %arg8[%c0_44, %c0_45, %c0_46], %51 {strides = array<i32>} : memref<1x16x256xf32, #tpu.memory_space<vmem>>, vector<1x16x256xf32>,
    return
  }
  func.func @transform_0(%arg0: i32) -> (i32, i32, i32) {
    %c0_i32 = arith.constant 0 : i32
    %c0_i32_0 = arith.constant 0 : i32
    %c0_i32_1 = arith.constant 0 : i32
    return %arg0, %c0_i32, %c0_i32_0 : i32, i32, i32
  }
  func.func @transform_1(%arg0: i32) -> (i32, i32) {
    %c0_i32 = arith.constant 0 : i32
    %c0_i32_0 = arith.constant 0 : i32
    %c0_i32_1 = arith.constant 0 : i32
    return %c0_i32, %c0_i32_0 : i32, i32
  }
  func.func @transform_2(%arg0: i32) -> (i32, i32, i32) {
    %c0_i32 = arith.constant 0 : i32
    %c0_i32_0 = arith.constant 0 : i32
    %c0_i32_1 = arith.constant 0 : i32
    %c0_i32_2 = arith.constant 0 : i32
    return %c0_i32, %c0_i32_0, %c0_i32_1 : i32, i32, i32
  }
  func.func @transform_3(%arg0: i32) -> (i32, i32) {
    %c0_i32 = arith.constant 0 : i32
    %c0_i32_0 = arith.constant 0 : i32
    %c0_i32_1 = arith.constant 0 : i32
    return %c0_i32, %c0_i32_0 : i32, i32
  }
  func.func @transform_4(%arg0: i32) -> (i32, i32, i32) {
    %c0_i32 = arith.constant 0 : i32
    %c0_i32_0 = arith.constant 0 : i32
    %c0_i32_1 = arith.constant 0 : i32
    %c0_i32_2 = arith.constant 0 : i32
    return %c0_i32, %c0_i32_0, %c0_i32_1 : i32, i32, i32
  }
  func.func @transform_5(%arg0: i32) -> (i32, i32, i32) {
    %c0_i32 = arith.constant 0 : i32
    %c0_i32_0 = arith.constant 0 : i32
    %c0_i32_1 = arith.constant 0 : i32
    %c0_i32_2 = arith.constant 0 : i32
    return %c0_i32, %c0_i32_0, %c0_i32_1 : i32, i32, i32
  }
  func.func @transform_6(%arg0: i32) -> (i32, i32) {
    %c0_i32 = arith.constant 0 : i32
    %c0_i32_0 = arith.constant 0 : i32
    %c0_i32_1 = arith.constant 0 : i32
    return %c0_i32, %c0_i32_0 : i32, i32
  }
  func.func @transform_7(%arg0: i32) -> (i32, i32, i32) {
    %c0_i32 = arith.constant 0 : i32
    %c0_i32_0 = arith.constant 0 : i32
    %c0_i32_1 = arith.constant 0 : i32
    return %arg0, %c0_i32, %c0_i32_0 : i32, i32, i32
  }
}

</mosaic_0001>

<bundles_post_ra>
// kernel: tile.19
= control target key start
LH: loop header
LB: loop body
LE: loop exit
PB: predicated region body
PF: predicated region fallthrough
CT: control target
= control target key end

     0   :  { %vm4_vm0 = vcmask 1047556   ;;  %s209_s14 = smov 96   ;;  %s210_s19 = smov 112   ;;  %vm6_vm1 = vcmask 130048   ;;  %vm25_vm2 = vcmask 1048448   ;;  %vm46_vm3 = vcmask 917248   ;;  %s388_s0 = inlined_call_operand.vmem [shape: f32[16,8,16], index: 0, kind: input, shape index: {}]   ;;  %s389_s1 = inlined_call_operand.vmem [shape: f32[16,128], index: 1, kind: output, shape index: {}]  }
   0x1   :  { %v172_v0 = vld [vmem:[%s388_s0 + $0x6] ss:$8 sm:$0xf]   ;;  %v167_v3 = vld [vmem:[%s388_s0 + $0x7] ss:$8 sm:$0xf]  }
   0x2   :  { %v173_v1 = vld [vmem:[%s388_s0 + $0x6] ss:$8 sm:$0xf0]   ;;  %v168_v4 = vld [vmem:[%s388_s0 + $0x7] ss:$8 sm:$0xf0]  }
   0x3   :  { %v43_v2 = vsel %vm4_vm0, %v173_v1, %v172_v0  ;;  %v22_v5 = vsel %vm4_vm0, %v168_v4, %v167_v3  ;;  %v174_v6 = vld [vmem:[%s388_s0 + $0x46] ss:$8 sm:$0xf]   ;;  %v169_v9 = vld [vmem:[%s388_s0 + $0x47] ss:$8 sm:$0xf]  }
   0x4   :  { %44 = vrot.lane.b32.xlu1 %v43_v2, %s209_s14  ;;  %v175_v7 = vld [vmem:[%s388_s0 + $0x46] ss:$8 sm:$0xf0]   ;;  %23 = vrot.lane.b32.xlu0 %v22_v5, %s210_s19  ;;  %v170_v10 = vld [vmem:[%s388_s0 + $0x47] ss:$8 sm:$0xf0]  }
   0x5   :  { %v53_v8 = vsel %vm4_vm0, %v175_v7, %v174_v6  ;;  %v32_v11 = vsel %vm4_vm0, %v170_v10, %v169_v9  ;;  %v179_v12 = vld [vmem:[%s388_s0 + $0x45] ss:$8 sm:$0xf]   ;;  %v184_v18 = vld [vmem:[%s388_s0 + $0x44] ss:$8 sm:$0xf]  }
   0x6   :  { %v180_v13 = vld [vmem:[%s388_s0 + $0x45] ss:$8 sm:$0xf0]   ;;  %v185_v19 = vld [vmem:[%s388_s0 + $0x44] ss:$8 sm:$0xf0]  }
   0x7   :  { %v177_v14 = vld [vmem:[%s388_s0 + $0x5] ss:$8 sm:$0xf]   ;;  %v74_v16 = vsel %vm4_vm0, %v180_v13, %v179_v12  ;;  %v182_v20 = vld [vmem:[%s388_s0 + $0x4] ss:$8 sm:$0xf]   ;;  %v95_v22 = vsel %vm4_vm0, %v185_v19, %v184_v18 }
   0x8   :  { %54 = vrot.lane.b32.xlu1 %v53_v8, %s209_s14  ;;  %v178_v15 = vld [vmem:[%s388_s0 + $0x5] ss:$8 sm:$0xf0]   ;;  %33 = vrot.lane.b32.xlu0 %v32_v11, %s210_s19  ;;  %v183_v21 = vld [vmem:[%s388_s0 + $0x4] ss:$8 sm:$0xf0]  }
   0x9   :  { %v64_v17 = vsel %vm4_vm0, %v178_v15, %v177_v14  ;;  %s211_s11 = smov 80   ;;  %v85_v23 = vsel %vm4_vm0, %v183_v21, %v182_v20  ;;  %v189_v24 = vld [vmem:[%s388_s0 + $0x43] ss:$8 sm:$0xf]   ;;  %s212_s20 = smov 64   ;;  %vm67_vm4 = vcmask 786048  }
   0xa   :  { %v190_v25 = vld [vmem:[%s388_s0 + $0x43] ss:$8 sm:$0xf0]   ;;  %v194_v28 = vld [vmem:[%s388_s0 + $0x42] ss:$8 sm:$0xf]  }
   0xb   :  { %v187_v26 = vld [vmem:[%s388_s0 + $0x3] ss:$8 sm:$0xf]   ;;  %v195_v29 = vld [vmem:[%s388_s0 + $0x42] ss:$8 sm:$0xf0]   ;;  %v116_v30 = vsel %vm4_vm0, %v190_v25, %v189_v24 }
   0xc   :  { %75 = vrot.lane.b32.xlu1 %v74_v16, %s211_s11  ;;  %65 = vrot.lane.b32.xlu0 %v64_v17, %s211_s11  ;;  %v188_v27 = vld [vmem:[%s388_s0 + $0x3] ss:$8 sm:$0xf0]   ;;  %v192_v31 = vld [vmem:[%s388_s0 + $0x2] ss:$8 sm:$0xf]   ;;  %v137_v40 = vsel %vm4_vm0, %v195_v29, %v194_v28 }
   0xd   :  { %v2_v32 = vld [vmem:[%s388_s0] ss:$8 sm:$0xf]   ;;  %v106_v33 = vsel %vm4_vm0, %v188_v27, %v187_v26  ;;  %v193_v36 = vld [vmem:[%s388_s0 + $0x2] ss:$8 sm:$0xf0]  }
   0xe   :  { %v3_v34 = vld [vmem:[%s388_s0] ss:$8 sm:$0xf0]   ;;  %s213_s8 = smov 48   ;;  %v127_v41 = vsel %vm4_vm0, %v193_v36, %v192_v31  ;;  %s215_s21 = smov 16   ;;  %vm88_vm5 = vcmask 654848  }
   0xf   :  { %v164_v35 = vld [vmem:[%s388_s0 + $0x40] ss:$8 sm:$0xf]   ;;  %v5_v37 = vsel %vm4_vm0, %v3_v34, %v2_v32  ;;  %v199_v42 = vld [vmem:[%s388_s0 + $0x41] ss:$8 sm:$0xf]  }
  0x10   :  { %96 = vrot.lane.b32.xlu1 %v95_v22, %s212_s20  ;;  %86 = vrot.lane.b32.xlu0 %v85_v23, %s212_s20  ;;  %v165_v38 = vld [vmem:[%s388_s0 + $0x40] ss:$8 sm:$0xf0]   ;;  %7 = vst.msk [vmem:[%s389_s1] sm:$0xff] %vm6_vm1, %v5_v37   ;;  %vm109_vm6 = vcmask 523648   ;;  %vm130_vm7 = vcmask 392448  }
  0x11   :  { %v13_v39 = vsel %vm4_vm0, %v165_v38, %v164_v35  ;;  %v200_v43 = vld [vmem:[%s388_s0 + $0x41] ss:$8 sm:$0xf0]   ;;  %vm151_vm8 = vcmask 261248  }
  0x12   :  { %166 = vst.msk [vmem:[%s389_s1 + $0x8] sm:$0xff] %vm6_vm1, %v13_v39   ;;  %v197_v44 = vld [vmem:[%s388_s0 + $0x1] ss:$8 sm:$0xf]   ;;  %v158_v46 = vsel %vm4_vm0, %v200_v43, %v199_v42 }
  0x13   :  { %v198_v45 = vld [vmem:[%s388_s0 + $0x1] ss:$8 sm:$0xf0]   ;;  %s214_s0 = smov 32  }
  0x14   :  { %117 = vrot.lane.b32.xlu1 %v116_v30, %s213_s8  ;;  %107 = vrot.lane.b32.xlu0 %v106_v33, %s213_s8  ;;  %v148_v47 = vsel %vm4_vm0, %v198_v45, %v197_v44 }
  0x18   :  { %138 = vrot.lane.b32.xlu1 %v137_v40, %s214_s0  ;;  %128 = vrot.lane.b32.xlu0 %v127_v41, %s214_s0 }
  0x1c   :  { %159 = vrot.lane.b32.xlu1 %v158_v46, %s215_s21  ;;  %149 = vrot.lane.b32.xlu0 %v148_v47, %s215_s21 }
  0x76   :  { %v45_v48 = vpop.permute.xlu1 %44   ;;  %v24_v49 = vpop.permute.xlu0 %23  }
  0x77   :  { %26 = vst.msk [vmem:[%s389_s1] sm:$0xff] %vm25_vm2, %v24_v49  }
  0x78   :  { %47 = vst.msk [vmem:[%s389_s1] sm:$0xff] %vm46_vm3, %v45_v48  }
  0x7a   :  { %v55_v50 = vpop.permute.xlu1 %54   ;;  %v34_v51 = vpop.permute.xlu0 %33  }
  0x7b   :  { %171 = vst.msk [vmem:[%s389_s1 + $0x8] sm:$0xff] %vm25_vm2, %v34_v51  }
  0x7c   :  { %176 = vst.msk [vmem:[%s389_s1 + $0x8] sm:$0xff] %vm46_vm3, %v55_v50  }
  0x7e   :  { %v76_v52 = vpop.permute.xlu1 %75   ;;  %v66_v53 = vpop.permute.xlu0 %65  }
  0x7f   :  { %181 = vst.msk [vmem:[%s389_s1 + $0x8] sm:$0xff] %vm67_vm4, %v76_v52   ;;  %68 = vst.msk [vmem:[%s389_s1] sm:$0xff] %vm67_vm4, %v66_v53  }
  0x82   :  { %v97_v54 = vpop.permute.xlu1 %96   ;;  %v87_v55 = vpop.permute.xlu0 %86  }
  0x83   :  { %186 = vst.msk [vmem:[%s389_s1 + $0x8] sm:$0xff] %vm88_vm5, %v97_v54   ;;  %89 = vst.msk [vmem:[%s389_s1] sm:$0xff] %vm88_vm5, %v87_v55  }
  0x86   :  { %v118_v56 = vpop.permute.xlu1 %117   ;;  %v108_v57 = vpop.permute.xlu0 %107  }
  0x87   :  { %191 = vst.msk [vmem:[%s389_s1 + $0x8] sm:$0xff] %vm109_vm6, %v118_v56   ;;  %110 = vst.msk [vmem:[%s389_s1] sm:$0xff] %vm109_vm6, %v108_v57  }
  0x8a   :  { %v139_v58 = vpop.permute.xlu1 %138   ;;  %v129_v59 = vpop.permute.xlu0 %128  }
  0x8b   :  { %196 = vst.msk [vmem:[%s389_s1 + $0x8] sm:$0xff] %vm130_vm7, %v139_v58   ;;  %131 = vst.msk [vmem:[%s389_s1] sm:$0xff] %vm130_vm7, %v129_v59  }
  0x8e   :  { %v160_v60 = vpop.permute.xlu1 %159   ;;  %v150_v61 = vpop.permute.xlu0 %149  }
  0x8f   :  { %201 = vst.msk [vmem:[%s389_s1 + $0x8] sm:$0xff] %vm151_vm8, %v160_v60   ;;  %152 = vst.msk [vmem:[%s389_s1] sm:$0xff] %vm151_vm8, %v150_v61  }

// kernel: mul.25
= control target key start
LH: loop header
LB: loop body
LE: loop exit
PB: predicated region body
PF: predicated region fallthrough
CT: control target
= control target key end

     0   :  { %s34_s0 = inlined_call_operand.vmem [shape: f32[16,1], index: 0, kind: input, shape index: {}]   ;;  %s35_s1 = inlined_call_operand.vmem [shape: f32[16,1], index: 1, kind: input, shape index: {}]   ;;  %s36_s2 = inlined_call_operand.vmem [shape: f32[16,1], index: 2, kind: output, shape index: {}]  }
   0x1   :  { %v3_v0 = vld [vmem:[%s34_s0] sm:$0x1] }
   0x2   :  { %v4_v1 = vld [vmem:[%s35_s1] sm:$0x1] }
   0x3   :  { %v7_v2 = vmul.f32 %v4_v1, %v3_v0 }
   0x5   :  { %9 = vst [vmem:[%s36_s2] sm:$0x1] %v7_v2 }

// kernel: st_gen_deconv_forward.1
= control target key start
LH: loop header
LB: loop body
LE: loop exit
PB: predicated region body
PF: predicated region fallthrough
CT: control target
= control target key end

     0   :  { %s1963_s24 = smov 0   ;;  %s2515_s0 = inlined_call_operand.vmem [shape: f32[2,16,128], index: 0, kind: input, shape index: {}]   ;;  %s2516_s1 = inlined_call_operand.vmem [shape: f32[48,16], index: 1, kind: input, shape index: {}]   ;;  %s2517_s2 = inlined_call_operand.vmem [shape: f32[3,128,128], index: 2, kind: input, shape index: {}]   ;;  %s2518_s3 = inlined_call_operand.vmem [shape: f32[16,128], index: 3, kind: input, shape index: {}]   ;;  %s2519_s4 = inlined_call_operand.vmem [shape: f32[3,128,256], index: 4, kind: input, shape index: {}]   ;;  %s2520_s5 = inlined_call_operand.vmem [shape: f32[3,16,16], index: 5, kind: input, shape index: {}]   ;;  %s2521_s6 = inlined_call_operand.vmem [shape: f32[16,1], index: 6, kind: input, shape index: {}]   ;;  %s2522_s7 = inlined_call_operand.vmem [shape: f32[2,16,256], index: 7, kind: output, shape index: {}]  }
   0x1 LB: > { %s1371_s25 = sadd.s32 4294967295, %s1919_s24   ;;  %p1375_p0 = scmp.ge.s32.totalorder %s1919_s24, 1  ;;  %s1919_s24 = sphi %s1963_s24, %s17_s24  }
   0x2   : > { %p237_p1 = scmp.lt.s32.totalorder %s1919_s24, 3 }
   0x4   : > { %p238_p2 = pnand %p1375_p0, %p237_p1 }
   0x5   : > { %p269_p3 = scmp.lt.s32.totalorder (!%p238_p2), %s1371_s25, 1  ;;  %v281_v0 = vld [vmem:[%s2516_s1] sm:$0xff] (!%p238_p2)  ;;  %vm287_vm0 = vcmask (!%p238_p2), 130048   ;;  %v404_v2 = vld [vmem:[%s2517_s2 + $0x8] sm:$0xff] (!%p238_p2)  ;;  %v405_v3 = vld [vmem:[%s2517_s2 + $0x10] sm:$0xff] (!%p238_p2) }
   0x6   : > { %241 = sbr.rel (%p238_p2) target bundleno = 1029 (0x405), region = 48  ;;  %1562 = vmatprep.mubr.msk.f32.mxu0 (!%p238_p2), %vm287_vm0, %v281_v0  ;;  %v403_v1 = vld [vmem:[%s2517_s2] sm:$0xff] (!%p238_p2)  ;;  %v406_v5 = vld [vmem:[%s2517_s2 + $0x18] sm:$0xff] (!%p238_p2)  ;;  %v408_v8 = vld [vmem:[%s2517_s2 + $0x28] sm:$0xff] (!%p238_p2) }
   0x7   : > { %v1680_v4 = vpack.c.bf16 (!%p238_p2), %v404_v2, %v403_v1  ;;  %v1684_v6 = vpack.c.bf16 (!%p238_p2), %v406_v5, %v405_v3  ;;  %v407_v7 = vld [vmem:[%s2517_s2 + $0x20] sm:$0xff] (!%p238_p2)  ;;  %v409_v13 = vld [vmem:[%s2517_s2 + $0x30] sm:$0xff] (!%p238_p2)  ;;  %v410_v14 = vld [vmem:[%s2517_s2 + $0x38] sm:$0xff] (!%p238_p2) }
   0x8   : > { %v1688_v12 = vpack.c.bf16 (!%p238_p2), %v408_v8, %v407_v7  ;;  %v282_v15 = vld [vmem:[%s2516_s1 + $0x8] sm:$0xff] (!%p238_p2)  ;;  %v283_v16 = vld [vmem:[%s2516_s1 + $0x10] sm:$0xff] (!%p238_p2)  ;;  %v1692_v17 = vpack.c.bf16 (!%p238_p2), %v410_v14, %v409_v13  ;;  %v411_v18 = vld [vmem:[%s2517_s2 + $0x40] sm:$0xff] (!%p238_p2) }
   0x9   : > { %1681 = vmatprep.subr.bf16.mxu1 (!%p238_p2), %v1680_v4  ;;  %v412_v19 = vld [vmem:[%s2517_s2 + $0x48] sm:$0xff] (!%p238_p2)  ;;  %v284_v20 = vld [vmem:[%s2516_s1 + $0x18] sm:$0xff] (!%p238_p2)  ;;  %v285_v21 = vld [vmem:[%s2516_s1 + $0x20] sm:$0xff] (!%p238_p2) }
   0xa   : > { %1683 = vmatpush3.bf16.msra.mxu1 (!%p238_p2), %v1680_v4  ;;  %v1696_v22 = vpack.c.bf16 (!%p238_p2), %v412_v19, %v411_v18  ;;  %v413_v23 = vld [vmem:[%s2517_s2 + $0x50] sm:$0xff] (!%p238_p2)  ;;  %v414_v24 = vld [vmem:[%s2517_s2 + $0x58] sm:$0xff] (!%p238_p2)  ;;  %v286_v25 = vld [vmem:[%s2516_s1 + $0x28] sm:$0xff] (!%p238_p2) }
   0xb   : > { %1685 = vmatprep.subr.bf16.mxu1 (!%p238_p2), %v1684_v6  ;;  %v1700_v26 = vpack.c.bf16 (!%p238_p2), %v414_v24, %v413_v23  ;;  %v415_v27 = vld [vmem:[%s2517_s2 + $0x60] sm:$0xff] (!%p238_p2)  ;;  %v416_v28 = vld [vmem:[%s2517_s2 + $0x68] sm:$0xff] (!%p238_p2)  ;;  %v417_v30 = vld [vmem:[%s2517_s2 + $0x70] sm:$0xff] (!%p238_p2) }
   0xc   : > { %v1704_v29 = vpack.c.bf16 (!%p238_p2), %v416_v28, %v415_v27  ;;  %v418_v31 = vld [vmem:[%s2517_s2 + $0x78] sm:$0xff] (!%p238_p2)  ;;  %v1386_v33 = vld [vmem:[%s2517_s2 + $0x80] sm:$0xff] (!%p238_p2)  ;;  %v1387_v34 = vld [vmem:[%s2517_s2 + $0x88] sm:$0xff] (!%p238_p2) }
   0xd   : > { %s2524_s25 = smov (!%p269_p3, %s1371_s25), 1  ;;  %v1708_v32 = vpack.c.bf16 %v418_v31, %v417_v30  ;;  %v2061_v35 = vpack.c.bf16 %v1387_v34, %v1386_v33  ;;  %v687_v36 = vld [vmem:[%s2519_s4 + $0x8] sm:$0xff]  ;;  %v689_v37 = vld [vmem:[%s2519_s4 + $0x18] sm:$0xff]  ;;  %v686_v38 = vld [vmem:[%s2519_s4] sm:$0xff] }
   0xe   : > { %s1494_s13 = sshll.u32 %s2524_s25, 4  ;;  %1687 = vmatpush3.bf16.msra.mxu1 %v1684_v6  ;;  %v1776_v39 = vpack.c.bf16 %v689_v37, %v687_v36  ;;  %v688_v40 = vld [vmem:[%s2519_s4 + $0x10] sm:$0xff]  ;;  %v691_v41 = vld [vmem:[%s2519_s4 + $0x28] sm:$0xff]  ;;  %v693_v42 = vld [vmem:[%s2519_s4 + $0x38] sm:$0xff]  ;;  %s1495_s12 = sshll.u32 %s2524_s25, 5 }
   0xf   : > { %s273_s20 = scalar_lea.vmem %s2515_s0, %s1494_s13  ;;  %1689 = vmatprep.subr.bf16.mxu1 %v1688_v12  ;;  %v1778_v43 = vpack.c.bf16 %v688_v40, %v686_v38  ;;  %v1780_v44 = vpack.c.bf16 %v693_v42, %v691_v41  ;;  %v690_v45 = vld [vmem:[%s2519_s4 + $0x20] sm:$0xff]  ;;  %v692_v46 = vld [vmem:[%s2519_s4 + $0x30] sm:$0xff]  ;;  %v695_v47 = vld [vmem:[%s2519_s4 + $0x48] sm:$0xff]  ;;  %s278_s15 = scalar_lea.vmem %s2522_s7, %s1495_s12 }
  0x10   : > { %v1999_v9 = vld [vmem:[%s273_s20] sm:$0xff]  ;;  %v2001_v10 = vld [vmem:[%s273_s20 + $0x8] sm:$0xff]  ;;  %v697_v48 = vld [vmem:[%s2519_s4 + $0x58] sm:$0xff]  ;;  %v1782_v49 = vpack.c.bf16 %v692_v46, %v690_v45 }
  0x11   : > { %v1676_v11 = vpack.c.bf16 %v2001_v10, %v1999_v9  ;;  %v1784_v50 = vpack.c.bf16 %v697_v48, %v695_v47  ;;  %v694_v51 = vld [vmem:[%s2519_s4 + $0x40] sm:$0xff]  ;;  %v696_v52 = vld [vmem:[%s2519_s4 + $0x50] sm:$0xff]  ;;  %v699_v53 = vld [vmem:[%s2519_s4 + $0x68] sm:$0xff] }
  0x12   : > { %1691 = vmatpush3.bf16.msra.mxu1 %v1688_v12  ;;  %v701_v54 = vld [vmem:[%s2519_s4 + $0x78] sm:$0xff]  ;;  %v1786_v55 = vpack.c.bf16 %v696_v52, %v694_v51  ;;  %v698_v57 = vld [vmem:[%s2519_s4 + $0x60] sm:$0xff]  ;;  %v700_v58 = vld [vmem:[%s2519_s4 + $0x70] sm:$0xff] }
  0x13   : > { %1677 = vmatprep.subr.bf16.mxu0 %v1676_v11  ;;  %1693 = vmatprep.subr.bf16.mxu1 %v1692_v17  ;;  %v1788_v56 = vpack.c.bf16 %v701_v54, %v699_v53  ;;  %v703_v59 = vld [vmem:[%s2519_s4 + $0x88] sm:$0xff]  ;;  %v705_v60 = vld [vmem:[%s2519_s4 + $0x98] sm:$0xff]  ;;  %v1790_v61 = vpack.c.bf16 %v700_v58, %v698_v57  ;;  %v702_v63 = vld [vmem:[%s2519_s4 + $0x80] sm:$0xff] }
  0x14   : > { %1679 = vmatpush3.bf16.msra.mxu0 %v1676_v11  ;;  %v1792_v62 = vpack.c.bf16 %v705_v60, %v703_v59  ;;  %v704_v0 = vld [vmem:[%s2519_s4 + $0x90] sm:$0xff]  ;;  %v707_v1 = vld [vmem:[%s2519_s4 + $0xa8] sm:$0xff]  ;;  %v709_v2 = vld [vmem:[%s2519_s4 + $0xb8] sm:$0xff] }
  0x15   : > { %1777 = vmatprep.subr.bf16.mxu0 %v1776_v39  ;;  %v1794_v3 = vpack.c.bf16 %v704_v0, %v702_v63  ;;  %v1796_v4 = vpack.c.bf16 %v709_v2, %v707_v1  ;;  %v706_v5 = vld [vmem:[%s2519_s4 + $0xa0] sm:$0xff]  ;;  %v708_v6 = vld [vmem:[%s2519_s4 + $0xb0] sm:$0xff]  ;;  %v711_v7 = vld [vmem:[%s2519_s4 + $0xc8] sm:$0xff] }
  0x16   : > { %1695 = vmatpush3.bf16.msra.mxu1 %v1692_v17  ;;  %v713_v8 = vld [vmem:[%s2519_s4 + $0xd8] sm:$0xff]  ;;  %v1798_v11 = vpack.c.bf16 %v708_v6, %v706_v5  ;;  %v710_v13 = vld [vmem:[%s2519_s4 + $0xc0] sm:$0xff]  ;;  %v712_v14 = vld [vmem:[%s2519_s4 + $0xd0] sm:$0xff] }
  0x17   : > { %1563 = vmatmul.mubr.msk.f32.vlgmr.msra.gmra.mrb[0].mxu0 %vm287_vm0, %v282_v15  ;;  %1697 = vmatprep.subr.bf16.mxu1 %v1696_v22  ;;  %v1800_v12 = vpack.c.bf16 %v713_v8, %v711_v7  ;;  %v1802_v15 = vpack.c.bf16 %v712_v14, %v710_v13  ;;  %v1389_v17 = vld [vmem:[%s2517_s2 + $0x98] sm:$0xff]  ;;  %v1394_v31 = vld [vmem:[%s2517_s2 + $0xc0] sm:$0xff]  ;;  %v1396_v34 = vld [vmem:[%s2517_s2 + $0xd0] sm:$0xff]  ;;  %v1921_v14 = vmov 0.0  }
  0x18   : > { %1565 = vmatprep.mubr.msk.f32.mxu0 %vm287_vm0, %v283_v16  ;;  %1779 = vmatpush1.bf16.msra.mxu0 %v1778_v43  ;;  %v1388_v16 = vld [vmem:[%s2517_s2 + $0x90] sm:$0xff]  ;;  %v1393_v27 = vld [vmem:[%s2517_s2 + $0xb8] sm:$0xff]  ;;  %v1398_v37 = vld [vmem:[%s2517_s2 + $0xe0] sm:$0xff] }
  0x19   : > { %1781 = vmatprep.subr.bf16.mxu0 %v1780_v44  ;;  %v1399_v38 = vld [vmem:[%s2517_s2 + $0xe8] sm:$0xff]  ;;  %v1400_v40 = vld [vmem:[%s2517_s2 + $0xf0] sm:$0xff]  ;;  %v1401_v41 = vld [vmem:[%s2517_s2 + $0xf8] sm:$0xff] }
  0x1a   : > { %1699 = vmatpush3.bf16.msra.mxu1 %v1696_v22  ;;  %v1391_v22 = vld [vmem:[%s2517_s2 + $0xa8] sm:$0xff]  ;;  %v1736_v39 = vpack.c.bf16 %v1399_v38, %v1398_v37  ;;  %v1740_v42 = vpack.c.bf16 %v1401_v41, %v1400_v40  ;;  %v1402_v43 = vld [vmem:[%s2517_s2 + $0x100] sm:$0xff]  ;;  %v1404_v46 = vld [vmem:[%s2517_s2 + $0x110] sm:$0xff] }
  0x1b   : > { %1566 = vmatmul.mubr.msk.f32.gmra.mrb[2].mxu0 %vm287_vm0, %v284_v20  ;;  %1701 = vmatprep.subr.bf16.mxu1 %v1700_v26  ;;  %v1716_v20 = vpack.c.bf16 %v1389_v17, %v1388_v16  ;;  %v1403_v44 = vld [vmem:[%s2517_s2 + $0x108] sm:$0xff]  ;;  %v1405_v47 = vld [vmem:[%s2517_s2 + $0x118] sm:$0xff]  ;;  %v1408_v52 = vld [vmem:[%s2517_s2 + $0x130] sm:$0xff] }
  0x1c   : > { %1568 = vmatprep.mubr.msk.f32.mxu0 %vm287_vm0, %v285_v21  ;;  %1783 = vmatpush1.bf16.msra.mxu0 %v1782_v49  ;;  %v1390_v21 = vld [vmem:[%s2517_s2 + $0xa0] sm:$0xff]  ;;  %v1744_v45 = vpack.c.bf16 %v1403_v44, %v1402_v43  ;;  %v1748_v48 = vpack.c.bf16 %v1405_v47, %v1404_v46  ;;  %v1409_v53 = vld [vmem:[%s2517_s2 + $0x138] sm:$0xff]  ;;  %v1412_v58 = vld [vmem:[%s2517_s2 + $0x150] sm:$0xff] }
  0x1d   : > { %1785 = vmatprep.subr.bf16.mxu0 %v1784_v50  ;;  %v1720_v24 = vpack.c.bf16 %v1391_v22, %v1390_v21  ;;  %v1406_v49 = vld [vmem:[%s2517_s2 + $0x120] sm:$0xff]  ;;  %v1407_v50 = vld [vmem:[%s2517_s2 + $0x128] sm:$0xff]  ;;  %v1756_v54 = vpack.c.bf16 %v1409_v53, %v1408_v52  ;;  %v1413_v59 = vld [vmem:[%s2517_s2 + $0x158] sm:$0xff] }
  0x1e   : > { %1703 = vmatpush3.bf16.msra.mxu1 %v1700_v26  ;;  %v1392_v26 = vld [vmem:[%s2517_s2 + $0xb0] sm:$0xff]  ;;  %v1752_v51 = vpack.c.bf16 %v1407_v50, %v1406_v49  ;;  %v1764_v60 = vpack.c.bf16 %v1413_v59, %v1412_v58  ;;  %v1417_v1 = vld [vmem:[%s2517_s2 + $0x178] sm:$0xff]  ;;  %v714_v6 = vld [vmem:[%s2519_s4 + $0xe0] sm:$0xff] }
  0x1f   : > { %1569 = vmatmul.mubr.msk.f32.gmra.mrb[4].mxu0 %vm287_vm0, %v286_v25  ;;  %1705 = vmatprep.subr.bf16.mxu1 %v1704_v29  ;;  %v1416_v0 = vld [vmem:[%s2517_s2 + $0x170] sm:$0xff]  ;;  %v1418_v17 = vld [vmem:[%s2519_s4 + $0x100] sm:$0xff]  ;;  %v1423_v21 = vld [vmem:[%s2519_s4 + $0x128] sm:$0xff] }
  0x20   : > { %1787 = vmatpush1.bf16.msra.mxu0 %v1786_v55  ;;  %v1410_v55 = vld [vmem:[%s2517_s2 + $0x140] sm:$0xff]  ;;  %v1772_v2 = vpack.c.bf16 %v1417_v1, %v1416_v0  ;;  %v716_v7 = vld [vmem:[%s2519_s4 + $0xf0] sm:$0xff]  ;;  %782 = vmatprep.mubr.f32.mxu0 %v1921_v14  ;;  %v1425_v22 = vld [vmem:[%s2519_s4 + $0x138] sm:$0xff] }
  0x21   : > { %1789 = vmatprep.subr.bf16.mxu0 %v1788_v56  ;;  %v1411_v56 = vld [vmem:[%s2517_s2 + $0x148] sm:$0xff]  ;;  %v1806_v8 = vpack.c.bf16 %v716_v7, %v714_v6  ;;  %v1433_v38 = vld [vmem:[%s2519_s4 + $0x178] sm:$0xff]  ;;  %v1430_v41 = vld [vmem:[%s2519_s4 + $0x160] sm:$0xff] }
  0x22   : > { %1707 = vmatpush3.bf16.msra.mxu1 %v1704_v29  ;;  %v1724_v29 = vpack.c.bf16 %v1393_v27, %v1392_v26  ;;  %v1760_v57 = vpack.c.bf16 %v1411_v56, %v1410_v55  ;;  %v1812_v27 = vpack.c.bf16 %v1425_v22, %v1423_v21  ;;  %v1431_v37 = vld [vmem:[%s2519_s4 + $0x168] sm:$0xff]  ;;  %v1437_v44 = vld [vmem:[%s2519_s4 + $0x198] sm:$0xff]  ;;  %v1434_v47 = vld [vmem:[%s2519_s4 + $0x180] sm:$0xff] }
  0x23   : > { %1709 = vmatprep.subr.bf16.mxu1 %v1708_v32  ;;  %v1820_v40 = vpack.c.bf16 %v1433_v38, %v1431_v37  ;;  %v1435_v43 = vld [vmem:[%s2519_s4 + $0x188] sm:$0xff]  ;;  %v1441_v50 = vld [vmem:[%s2519_s4 + $0x1b8] sm:$0xff]  ;;  %v1438_v53 = vld [vmem:[%s2519_s4 + $0x1a0] sm:$0xff] }
  0x24   : > { %1791 = vmatpush1.bf16.msra.mxu0 %v1790_v61  ;;  %v1414_v61 = vld [vmem:[%s2517_s2 + $0x160] sm:$0xff]  ;;  %v1824_v46 = vpack.c.bf16 %v1437_v44, %v1435_v43  ;;  %v1439_v49 = vld [vmem:[%s2519_s4 + $0x1a8] sm:$0xff]  ;;  %v1445_v56 = vld [vmem:[%s2519_s4 + $0x1d8] sm:$0xff] }
  0x25   : > { %1793 = vmatprep.subr.bf16.mxu0 %v1792_v62  ;;  %v1415_v62 = vld [vmem:[%s2517_s2 + $0x168] sm:$0xff]  ;;  %v1828_v52 = vpack.c.bf16 %v1441_v50, %v1439_v49  ;;  %v1442_v59 = vld [vmem:[%s2519_s4 + $0x1c0] sm:$0xff]  ;;  %v1474_v37 = vld [vmem:[%s2519_s4 + $0x290] sm:$0xff] }
  0x26   : > { %1711 = vmatpush3.bf16.msra.mxu1 %v1708_v32  ;;  %v1395_v32 = vld [vmem:[%s2517_s2 + $0xc8] sm:$0xff]  ;;  %v1768_v63 = vpack.c.bf16 %v1415_v62, %v1414_v61  ;;  %v1449_v62 = vld [vmem:[%s2519_s4 + $0x1f8] sm:$0xff]  ;;  %v1446_v1 = vld [vmem:[%s2519_s4 + $0x1e0] sm:$0xff] }
  0x27   : > { %1713 = vmatprep.subr.bf16.mxu1 %v2061_v35  ;;  %v1728_v33 = vpack.c.bf16 %v1395_v32, %v1394_v31  ;;  %v1429_v31 = vld [vmem:[%s2519_s4 + $0x158] sm:$0xff]  ;;  %v1443_v55 = vld [vmem:[%s2519_s4 + $0x1c8] sm:$0xff]  ;;  %v1456_v7 = vld [vmem:[%s2519_s4 + $0x200] sm:$0xff] }
  0x28   : > { %1795 = vmatpush1.bf16.msra.mxu0 %v1794_v3  ;;  %v715_v3 = vld [vmem:[%s2519_s4 + $0xe8] sm:$0xff]  ;;  %v1832_v58 = vpack.c.bf16 %v1445_v56, %v1443_v55  ;;  %v1464_v22 = vld [vmem:[%s2519_s4 + $0x240] sm:$0xff]  ;;  %v1487_v49 = vld [vmem:[%s2519_s4 + $0x2f8] sm:$0xff]  ;;  %v1922_v56 = vmov 0  }
  0x29   : > { %1797 = vmatprep.subr.bf16.mxu0 %v1796_v4  ;;  %v717_v4 = vld [vmem:[%s2519_s4 + $0xf8] sm:$0xff]  ;;  %v1447_v61 = vld [vmem:[%s2519_s4 + $0x1e8] sm:$0xff]  ;;  %v1292_v55 = vld [vmem:[%s2521_s6] sm:$0xff]  ;;  %1912 = vset.pattern.permute.xlu0 %v1922_v56 }
  0x2a   : > { %v1804_v5 = vpack.c.bf16 %v717_v4, %v715_v3  ;;  %v1836_v0 = vpack.c.bf16 %v1449_v62, %v1447_v61  ;;  %v1457_v3 = vld [vmem:[%s2519_s4 + $0x208] sm:$0xff]  ;;  %v1459_v4 = vld [vmem:[%s2519_s4 + $0x218] sm:$0xff]  ;;  %1296 = vperm.xlu0 %1912, %v1292_v55  }
  0x2b   : > { %v1848_v6 = vpack.c.bf16 %v1459_v4, %v1457_v3  ;;  %v1477_v38 = vld [vmem:[%s2519_s4 + $0x2a8] sm:$0xff] }
  0x2c   : > { %1799 = vmatpush1.bf16.msra.mxu0 %v1798_v11  ;;  %v1419_v11 = vld [vmem:[%s2519_s4 + $0x108] sm:$0xff] }
  0x2d   : > { %1801 = vmatprep.subr.bf16.mxu0 %v1800_v12  ;;  %v1421_v12 = vld [vmem:[%s2519_s4 + $0x118] sm:$0xff]  ;;  %v1481_v43 = vld [vmem:[%s2519_s4 + $0x2c8] sm:$0xff] }
  0x2e   : > { %v1808_v13 = vpack.c.bf16 %v1421_v12, %v1419_v11  ;;  %v1461_v11 = vld [vmem:[%s2519_s4 + $0x228] sm:$0xff]  ;;  %v1463_v12 = vld [vmem:[%s2519_s4 + $0x238] sm:$0xff] }
  0x30   : > { %1803 = vmatpush1.bf16.msra.mxu0 %v1802_v15  ;;  %v401_v15 = vld [vmem:[%s2518_s3] sm:$0xff] }
  0x31   : > { %1805 = vmatprep.subr.bf16.mxu0 %v1804_v5 }
  0x34   : > { %1807 = vmatpush1.bf16.msra.mxu0 %v1806_v8  ;;  %v1458_v8 = vld [vmem:[%s2519_s4 + $0x210] sm:$0xff] }
  0x35   : > { %1809 = vmatprep.subr.bf16.mxu0 %v1808_v13  ;;  %v1850_v13 = vpack.c.bf16 %v1458_v8, %v1456_v7  ;;  %v1451_v8 = vld [vmem:[%s2520_s5 + $0x18] sm:$0xff] }
  0xea   : > { %v1564_v18 = vpop.f32.mrb[0].mxu0 }
  0xeb   : > { %v372_v19 = vpop.f32.mrb[1].mxu0 }
  0xec   : > { %1603 = vmatprep.mubr.f32.mxu1 %v372_v19  ;;  %v402_v19 = vld [vmem:[%s2518_s3 + $0x8] sm:$0xff] }
  0xed   : > { %1604 = vmatmul.mubr.f32.vlgmr.msra.gmra.mrb[0].mxu1 %v1564_v18  ;;  %v1420_v18 = vld [vmem:[%s2519_s4 + $0x110] sm:$0xff] }
  0xee   : > { %1715 = vmatpush3.bf16.msra.mxu1 %v2061_v35  ;;  %v1567_v23 = vpop.f32.mrb[2].mxu0  ;;  %v1397_v35 = vld [vmem:[%s2517_s2 + $0xd8] sm:$0xff] }
  0xef   : > { %1717 = vmatprep.subr.bf16.mxu1 %v1716_v20  ;;  %v382_v25 = vpop.f32.mrb[3].mxu0  ;;  %v1732_v36 = vpack.c.bf16 %v1397_v35, %v1396_v34  ;;  %v1426_v35 = vld [vmem:[%s2519_s4 + $0x140] sm:$0xff] }
  0xf0   : > { %1638 = vmatprep.mubr.f32.mxu1 %v382_v25 }
  0xf2   : > { %1719 = vmatpush3.bf16.msra.mxu1 %v1716_v20  ;;  %v2167_v28 = vpop.f32.mrb[4].mxu0 }
  0xf3   : > { %1721 = vmatprep.subr.bf16.mxu1 %v1720_v24  ;;  %v392_v30 = vpop.f32.mrb[5].mxu0 }
  0xf6   : > { %1723 = vmatpush3.bf16.msra.mxu1 %v1720_v24  ;;  %v1810_v24 = vpack.c.bf16 %v1420_v18, %v1418_v17  ;;  %v1462_v17 = vld [vmem:[%s2519_s4 + $0x230] sm:$0xff]  ;;  %v1465_v18 = vld [vmem:[%s2519_s4 + $0x248] sm:$0xff] }
  0xf7   : > { %1725 = vmatprep.subr.bf16.mxu1 %v1724_v29 }
  0xfa   : > { %1727 = vmatpush3.bf16.msra.mxu1 %v1724_v29  ;;  %v1424_v29 = vld [vmem:[%s2519_s4 + $0x130] sm:$0xff] }
  0xfb   : > { %1729 = vmatprep.subr.bf16.mxu1 %v1728_v33 }
  0xfe   : > { %1731 = vmatpush3.bf16.msra.mxu1 %v1728_v33 }
  0xff   : > { %1733 = vmatprep.subr.bf16.mxu1 %v1732_v36 }
 0x102   : > { %1735 = vmatpush3.bf16.msra.mxu1 %v1732_v36  ;;  %v1428_v36 = vld [vmem:[%s2519_s4 + $0x150] sm:$0xff] }
 0x103   : > { %1737 = vmatprep.subr.bf16.mxu1 %v1736_v39 }
 0x106   : > { %1739 = vmatpush3.bf16.msra.mxu1 %v1736_v39  ;;  %v1818_v39 = vpack.c.bf16 %v1428_v36, %v1426_v35  ;;  %v1472_v36 = vld [vmem:[%s2519_s4 + $0x280] sm:$0xff] }
 0x107   : > { %1741 = vmatprep.subr.bf16.mxu1 %v1740_v42 }
 0x10a   : > { %1743 = vmatpush3.bf16.msra.mxu1 %v1740_v42  ;;  %v1432_v42 = vld [vmem:[%s2519_s4 + $0x170] sm:$0xff] }
 0x10b   : > { %1745 = vmatprep.subr.bf16.mxu1 %v1744_v45 }
 0x10d   : > { %1639 = vmatmul.mubr.f32.vlgmr.msra.gmra.mrb[0].mxu1 %v1567_v23 }
 0x10e   : > { %1747 = vmatpush3.bf16.msra.mxu1 %v1744_v45  ;;  %1673 = vmatprep.mubr.f32.mxu1 %v392_v30  ;;  %v1427_v30 = vld [vmem:[%s2519_s4 + $0x148] sm:$0xff]  ;;  %v1822_v45 = vpack.c.bf16 %v1432_v42, %v1430_v41  ;;  %v1476_v41 = vld [vmem:[%s2519_s4 + $0x2a0] sm:$0xff]  ;;  %v1478_v42 = vld [vmem:[%s2519_s4 + $0x2b0] sm:$0xff] }
 0x10f   : > { %1749 = vmatprep.subr.bf16.mxu1 %v1748_v48  ;;  %v1816_v34 = vpack.c.bf16 %v1429_v31, %v1427_v30  ;;  %v1470_v30 = vld [vmem:[%s2519_s4 + $0x270] sm:$0xff]  ;;  %v1473_v31 = vld [vmem:[%s2519_s4 + $0x288] sm:$0xff]  ;;  %v1870_v44 = vpack.c.bf16 %v1478_v42, %v1476_v41 }
 0x112   : > { %1751 = vmatpush3.bf16.msra.mxu1 %v1748_v48  ;;  %v1436_v48 = vld [vmem:[%s2519_s4 + $0x190] sm:$0xff] }
 0x113   : > { %1753 = vmatprep.subr.bf16.mxu1 %v1752_v51 }
 0x116   : > { %1755 = vmatpush3.bf16.msra.mxu1 %v1752_v51  ;;  %v1826_v51 = vpack.c.bf16 %v1436_v48, %v1434_v47  ;;  %v1482_v47 = vld [vmem:[%s2519_s4 + $0x2d0] sm:$0xff]  ;;  %v1485_v48 = vld [vmem:[%s2519_s4 + $0x2e8] sm:$0xff] }
 0x117   : > { %1757 = vmatprep.subr.bf16.mxu1 %v1756_v54 }
 0x11a   : > { %1759 = vmatpush3.bf16.msra.mxu1 %v1756_v54  ;;  %v1440_v54 = vld [vmem:[%s2519_s4 + $0x1b0] sm:$0xff] }
 0x11b   : > { %1761 = vmatprep.subr.bf16.mxu1 %v1760_v57 }
 0x11e   : > { %1763 = vmatpush3.bf16.msra.mxu1 %v1760_v57  ;;  %v1830_v57 = vpack.c.bf16 %v1440_v54, %v1438_v53  ;;  %v1486_v53 = vld [vmem:[%s2519_s4 + $0x2f0] sm:$0xff] }
 0x11f   : > { %1765 = vmatprep.subr.bf16.mxu1 %v1764_v60 }
 0x122   : > { %1767 = vmatpush3.bf16.msra.mxu1 %v1764_v60  ;;  %v1444_v60 = vld [vmem:[%s2519_s4 + $0x1d0] sm:$0xff] }
 0x123   : > { %1769 = vmatprep.subr.bf16.mxu1 %v1768_v63 }
 0x126   : > { %1771 = vmatpush3.bf16.msra.mxu1 %v1768_v63  ;;  %v1834_v63 = vpack.c.bf16 %v1444_v60, %v1442_v59 }
 0x127   : > { %1773 = vmatprep.subr.bf16.mxu1 %v1772_v2 }
 0x12a   : > { %1775 = vmatpush3.bf16.msra.mxu1 %v1772_v2  ;;  %v1448_v2 = vld [vmem:[%s2519_s4 + $0x1f0] sm:$0xff] }
 0x12b   : > { %v1838_v5 = vpack.c.bf16 %v1448_v2, %v1446_v1 }
 0x12d   : > { %1674 = vmatmul.mubr.f32.vlgmr.msra.gmra.mrb[0].mxu1 %v2167_v28  ;;  %v1422_v28 = vld [vmem:[%s2519_s4 + $0x120] sm:$0xff] }
 0x12e   : > { %992 = vmatprep.mubr.f32.mxu1 %v1921_v14  ;;  %v1814_v32 = vpack.c.bf16 %v1424_v29, %v1422_v28  ;;  %v1468_v29 = vld [vmem:[%s2519_s4 + $0x260] sm:$0xff] }
 0x200   : > { %v1675_v16 = vpop.f32.mrb[0].mxu1 }
 0x201   : > { %v673_v20 = vpop.f32.mrb[1].mxu1  ;;  %v1884_v25 = vadd.f32 %v1675_v16, %v402_v19  ;;  %v1460_v16 = vld [vmem:[%s2519_s4 + $0x220] sm:$0xff]  ;;  %v1467_v19 = vld [vmem:[%s2519_s4 + $0x258] sm:$0xff] }
 0x202   : > { %v1885_v23 = vadd.f32 %v673_v20, %v401_v15  ;;  %v1852_v15 = vpack.c.bf16 %v1463_v12, %v1461_v11  ;;  %v1854_v20 = vpack.c.bf16 %v1462_v17, %v1460_v16  ;;  %v1856_v21 = vpack.c.bf16 %v1467_v19, %v1465_v18  ;;  %v795_v12 = vld [vmem:[%s2520_s5] sm:$0xff] }
 0x203   : > { %v2296_v33 = vmax.f32 %v1884_v25, 0.0  ;;  %v1471_v25 = vld [vmem:[%s2519_s4 + $0x278] sm:$0xff] }
 0x204   : > { %v2280_v26 = vmax.f32 %v1885_v23, 0.0  ;;  %v1466_v23 = vld [vmem:[%s2519_s4 + $0x250] sm:$0xff] }
 0x206   : > { %783 = vmatmul.mubr.f32.vlgmr.msra.gmra.mrb[6].mxu0 %v2280_v26 }
 0x207   : > { %1811 = vmatpush1.bf16.msra.mxu0 %v1810_v24  ;;  %788 = vmatprep.mubr.f32.mxu0 %v1921_v14  ;;  %v1469_v24 = vld [vmem:[%s2519_s4 + $0x268] sm:$0xff] }
 0x208   : > { %1813 = vmatprep.subr.bf16.mxu0 %v1812_v27  ;;  %v1858_v27 = vpack.c.bf16 %v1466_v23, %v1464_v22  ;;  %v1860_v28 = vpack.c.bf16 %v1471_v25, %v1469_v24  ;;  %v1489_v22 = vld [vmem:[%s2520_s5 + $0x28] sm:$0xff] }
 0x20a   : > { %789 = vmatmul.mubr.f32.gmra.mrb[8].mxu0 %v2296_v33 }
 0x20b   : > { %1815 = vmatpush1.bf16.msra.mxu0 %v1814_v32  ;;  %894 = vmatprep.mubr.f32.mxu0 %v1921_v14  ;;  %v1475_v32 = vld [vmem:[%s2519_s4 + $0x298] sm:$0xff] }
 0x20c   : > { %1817 = vmatprep.subr.bf16.mxu0 %v1816_v34  ;;  %v1862_v34 = vpack.c.bf16 %v1470_v30, %v1468_v29  ;;  %v1864_v35 = vpack.c.bf16 %v1475_v32, %v1473_v31 }
 0x20f   : > { %1819 = vmatpush1.bf16.msra.mxu0 %v1818_v39  ;;  %v1866_v39 = vpack.c.bf16 %v1474_v37, %v1472_v36 }
 0x210   : > { %1821 = vmatprep.subr.bf16.mxu0 %v1820_v40 }
 0x213   : > { %1823 = vmatpush1.bf16.msra.mxu0 %v1822_v45 }
 0x214   : > { %1825 = vmatprep.subr.bf16.mxu0 %v1824_v46  ;;  %v1480_v46 = vld [vmem:[%s2519_s4 + $0x2c0] sm:$0xff] }
 0x215   : > { %v1874_v50 = vpack.c.bf16 %v1482_v47, %v1480_v46 }
 0x217   : > { %1827 = vmatpush1.bf16.msra.mxu0 %v1826_v51  ;;  %v1876_v51 = vpack.c.bf16 %v1487_v49, %v1485_v48 }
 0x218   : > { %1829 = vmatprep.subr.bf16.mxu0 %v1828_v52  ;;  %v1484_v52 = vld [vmem:[%s2519_s4 + $0x2e0] sm:$0xff] }
 0x219   : > { %v1878_v54 = vpack.c.bf16 %v1486_v53, %v1484_v52 }
 0x21b   : > { %1831 = vmatpush1.bf16.msra.mxu0 %v1830_v57  ;;  %v1293_v57 = vld [vmem:[%s2521_s6 + $0x8] sm:$0xff] }
 0x21c   : > { %1833 = vmatprep.subr.bf16.mxu0 %v1832_v58  ;;  %1301 = vperm.xlu0 %1912, %v1293_v57  }
 0x21f   : > { %1835 = vmatpush1.bf16.msra.mxu0 %v1834_v63 }
 0x220   : > { %1837 = vmatprep.subr.bf16.mxu0 %v1836_v0 }
 0x223   : > { %1839 = vmatpush1.bf16.msra.mxu0 %v1838_v5  ;;  %v1450_v5 = vld [vmem:[%s2520_s5 + $0x10] sm:$0xff] }
 0x224   : > { %1849 = vmatprep.subr.bf16.mxu0 %v1848_v6 }
 0x226   : > { %895 = vmatmul.mubr.f32.vlgmr.msra.gmra.mrb[10].mxu0 %v2280_v26 }
 0x227   : > { %1851 = vmatpush1.bf16.msra.mxu0 %v1850_v13  ;;  %900 = vmatprep.mubr.f32.mxu0 %v1921_v14  ;;  %v796_v13 = vld [vmem:[%s2520_s5 + $0x8] sm:$0xff] }
 0x228   : > { %1853 = vmatprep.subr.bf16.mxu0 %v1852_v15 }
 0x22a   : > { %901 = vmatmul.mubr.f32.gmra.mrb[12].mxu0 %v2296_v33 }
 0x22b   : > { %1855 = vmatpush1.bf16.msra.mxu0 %v1854_v20  ;;  %906 = vmatprep.mubr.f32.mxu0 %v1921_v14 }
 0x22c   : > { %1857 = vmatprep.subr.bf16.mxu0 %v1856_v21  ;;  %v1488_v21 = vld [vmem:[%s2520_s5 + $0x20] sm:$0xff] }
 0x22e   : > { %907 = vmatmul.mubr.f32.gmra.mrb[14].mxu0 %v1999_v9  ;;  %v1479_v9 = vld [vmem:[%s2519_s4 + $0x2b8] sm:$0xff] }
 0x22f   : > { %1859 = vmatpush1.bf16.msra.mxu0 %v1858_v27  ;;  %912 = vmatprep.mubr.f32.mxu0 %v1921_v14  ;;  %v1868_v40 = vpack.c.bf16 %v1479_v9, %v1477_v38 }
 0x230   : > { %1861 = vmatprep.subr.bf16.mxu0 %v1860_v28 }
 0x232   : > { %913 = vmatmul.mubr.f32.gmra.mrb[16].mxu0 %v2001_v10  ;;  %v1483_v10 = vld [vmem:[%s2519_s4 + $0x2d8] sm:$0xff] }
 0x233   : > { %1863 = vmatpush1.bf16.msra.mxu0 %v1862_v34  ;;  %1185 = vmatprep.mubr.f32.mxu0 %v1921_v14  ;;  %v1872_v45 = vpack.c.bf16 %v1483_v10, %v1481_v43  ;;  %v1297_v34 = vpop.permute.xlu0 %1296 }
 0x234   : > { %1865 = vmatprep.subr.bf16.mxu0 %v1864_v35 }
 0x237   : > { %1867 = vmatpush1.bf16.msra.mxu0 %v1866_v39 }
 0x238   : > { %1869 = vmatprep.subr.bf16.mxu0 %v1868_v40 }
 0x23b   : > { %1871 = vmatpush1.bf16.msra.mxu0 %v1870_v44 }
 0x23c   : > { %1873 = vmatprep.subr.bf16.mxu0 %v1872_v45 }
 0x23f   : > { %1875 = vmatpush1.bf16.msra.mxu0 %v1874_v50 }
 0x240   : > { %1877 = vmatprep.subr.bf16.mxu0 %v1876_v51 }
 0x243   : > { %1879 = vmatpush1.bf16.msra.mxu0 %v1878_v54 }
 0x246   : > { %1186 = vmatmul.mubr.f32.vlgmr.msra.gmra.mrb[18].mxu0 %v2280_v26 }
 0x247   : > { %1191 = vmatprep.mubr.f32.mxu0 %v1921_v14 }
 0x24a   : > { %1192 = vmatmul.mubr.f32.gmra.mrb[20].mxu0 %v2296_v33 }
 0x24b   : > { %1271 = vmatprep.mubr.f32.mxu0 %v1921_v14 }
 0x29b   : > { %v1302_v10 = vpop.permute.xlu0 %1301 }
 0x2d9   : > { %v784_v58 = vpop.f32.mrb[6].mxu0 }
 0x2da   : > { %v786_v26 = vpop.f32.mrb[7].mxu0 }
 0x2dd   : > { %v790_v59 = vpop.f32.mrb[8].mxu0 }
 0x2de   : > { %v1846_v60 = vpack.c.bf16 %v790_v59, %v784_v58  ;;  %v792_v61 = vpop.f32.mrb[9].mxu0 }
 0x2df   : > { %v1844_v33 = vpack.c.bf16 %v792_v61, %v786_v26 }
 0x2f9   : > { %v896_v62 = vpop.f32.mrb[10].mxu0 }
 0x2fa   : > { %v898_v63 = vpop.f32.mrb[11].mxu0 }
 0x2fd   : > { %v902_v0 = vpop.f32.mrb[12].mxu0 }
 0x2fe   : > { %v1842_v1 = vpack.c.bf16 %v902_v0, %v896_v62  ;;  %v904_v2 = vpop.f32.mrb[13].mxu0 }
 0x2ff   : > { %v1840_v3 = vpack.c.bf16 %v904_v2, %v898_v63 }
 0x301   : > { %1841 = vmatprep.subr.bf16.mxu1 %v1840_v3  ;;  %v908_v4 = vpop.f32.mrb[14].mxu0 }
 0x302   : > { %1843 = vmatpush1.bf16.msra.mxu1 %v1842_v1  ;;  %v910_v6 = vpop.f32.mrb[15].mxu0 }
 0x303   : > { %1845 = vmatprep.subr.bf16.mxu1 %v1844_v33 }
 0x305   : > { %1452 = vmatmul.mubr.msk.f32.vlgmr.msra.gmra.mrb[2].mxu1 %vm287_vm0, %v1450_v5  ;;  %v914_v7 = vpop.f32.mrb[16].mxu0 }
 0x306   : > { %1847 = vmatpush1.bf16.msra.mxu1 %v1846_v60  ;;  %998 = vmatprep.mubr.f32.mxu1 %v1921_v14  ;;  %v916_v11 = vpop.f32.mrb[17].mxu0 }
 0x309   : > { %1453 = vmatmul.mubr.msk.f32.gmra.mrb[4].mxu1 %vm287_vm0, %v1451_v8 }
 0x30a   : > { %1075 = vmatprep.mubr.f32.mxu1 %v1921_v14 }
 0x30d   : > { %1454 = vmatmul.mubr.msk.f32.vlgmr.msra.gmra.mrb[2].mxu1 %vm287_vm0, %v795_v12 }
 0x30e   : > { %1081 = vmatprep.mubr.f32.mxu1 %v1921_v14 }
 0x311   : > { %1455 = vmatmul.mubr.msk.f32.gmra.mrb[4].mxu1 %vm287_vm0, %v796_v13 }
 0x319   : > { %v1187_v15 = vpop.f32.mrb[18].mxu0 }
 0x31a   : > { %v1189_v16 = vpop.f32.mrb[19].mxu0 }
 0x31d   : > { %v1193_v17 = vpop.f32.mrb[20].mxu0 }
 0x31e   : > { %v1882_v18 = vpack.c.bf16 %v1193_v17, %v1187_v15  ;;  %v1195_v19 = vpop.f32.mrb[21].mxu0 }
 0x31f   : > { %v1880_v20 = vpack.c.bf16 %v1195_v19, %v1189_v16 }
 0x321   : > { %1881 = vmatprep.subr.bf16.mxu0 %v1880_v20 }
 0x322   : > { %1883 = vmatpush1.bf16.msra.mxu0 %v1882_v18 }
 0x325   : > { %1490 = vmatmul.mubr.msk.f32.vlgmr.msra.gmra.mrb[22].mxu0 %vm287_vm0, %v1488_v21 }
 0x326   : > { %1277 = vmatprep.mubr.f32.mxu0 %v1921_v14 }
 0x329   : > { %1491 = vmatmul.mubr.msk.f32.gmra.mrb[24].mxu0 %vm287_vm0, %v1489_v22 }
 0x3e0   : > { %v1077_v23 = vpop.f32.mrb[2].mxu1 }
 0x3e1   : > { %v1886_v24 = vadd.f32 %v1077_v23, %v908_v4  ;;  %v1079_v25 = vpop.f32.mrb[3].mxu1 }
 0x3e2   : > { %v1888_v27 = vadd.f32 %v1079_v25, %v910_v6 }
 0x3e4   : > { %v1083_v28 = vpop.f32.mrb[4].mxu1 }
 0x3e5   : > { %v1890_v29 = vadd.f32 %v1083_v28, %v914_v7  ;;  %v1085_v30 = vpop.f32.mrb[5].mxu1 }
 0x3e6   : > { %v1892_v31 = vadd.f32 %v1085_v30, %v916_v11 }
 0x3f8   : > { %v1273_v32 = vpop.f32.mrb[22].mxu0 }
 0x3f9   : > { %v1887_v35 = vadd.f32 %v1886_v24, %v1273_v32  ;;  %v1275_v36 = vpop.f32.mrb[23].mxu0 }
 0x3fa   : > { %v1889_v14 = vadd.f32 %v1888_v27, %v1275_v36 }
 0x3fb   : > { %v1304_v37 = vadd.f32 %v1887_v35, %v1297_v34 }
 0x3fc   : > { %v1305_v38 = vadd.f32 %v1889_v14, %v1297_v34  ;;  %v1279_v9 = vpop.f32.mrb[24].mxu0 }
 0x3fd   : > { %v1308_v39 = vmax.f32 %v1304_v37, 0.0  ;;  %v1891_v40 = vadd.f32 %v1890_v29, %v1279_v9  ;;  %v1281_v41 = vpop.f32.mrb[25].mxu0 }
 0x3fe   : > { %v1309_v42 = vmax.f32 %v1305_v38, 0.0  ;;  %v1893_v43 = vadd.f32 %v1892_v31, %v1281_v41 }
 0x3ff   : > { %1312 = vst [vmem:[%s278_s15] sm:$0xff] %v1308_v39  ;;  %v1306_v44 = vadd.f32 %v1891_v40, %v1302_v10 }
 0x400   : > { %1313 = vst [vmem:[%s278_s15 + $0x8] sm:$0xff] %v1309_v42  ;;  %v1307_v45 = vadd.f32 %v1893_v43, %v1302_v10 }
 0x401   : > { %v1310_v46 = vmax.f32 %v1306_v44, 0.0 }
 0x402   : > { %v1311_v47 = vmax.f32 %v1307_v45, 0.0 }
 0x403   : > { %1314 = vst [vmem:[%s278_s15 + $0x10] sm:$0xff] %v1310_v46 }
 0x404   : > { %1315 = vst [vmem:[%s278_s15 + $0x18] sm:$0xff] %v1311_v47 }
 0x405 PF: > { %s17_s24 = sadd.s32 1, %s1919_s24  }
 0x406   : > { %p14_p4 = scmp.ge.s32.totalorder %s17_s24, 4  }
 0x408   :  { %16 = sbr.rel (!%p14_p4) target bundleno = 1 (0x1), region = 84 }

</bundles_post_ra>
